<compile_context>
chip_gen: v7x
topology: tpu7x:2x2x1
jax: 0.10.0
libtpu: 0.0.40
codegen_flags: <defaults>
</compile_context>

<pallas_src>
import jax
import jax.numpy as jnp
from jax.experimental import pallas as pl
from jax.experimental.pallas import tpu as pltpu


def _round_up(n: int, m: int) -> int:
    return ((n + m - 1) // m) * m


def mlp_kernel(x_ref, w1_ref, b1_ref, w2_ref, b2_ref, o_ref):
    # hidden = relu(x @ w1 + b1): cast the f32 activation tile to bf16 right
    # before the MXU dot (VPU work hidden under the x DMA); accumulate in f32.
    h = jnp.dot(x_ref[...].astype(jnp.bfloat16), w1_ref[...],
                preferred_element_type=jnp.float32)
    h = jnp.maximum(h + b1_ref[...], 0.0)                    # bias + ReLU (VPU)
    # out = hidden @ w2 + b2 on the lane-aligned (128-wide) padded weights, then
    # slice down to the true action width and store the narrow block directly.
    o = jnp.dot(h.astype(jnp.bfloat16), w2_ref[...],
                preferred_element_type=jnp.float32)
    o = o + b2_ref[...]
    o_ref[...] = o[:, : o_ref.shape[1]].astype(o_ref.dtype)


def prepare_mlp_params(w1, b1, w2, b2):
    """One-time (init-time) parameter prep, off the per-call path.

    w1: (D, Hd), b1: (Hd,), w2: (Hd, A), b2: (A,) -- weights stored as
    (in_features, out_features), i.e. transposed vs. torch.nn.Linear.weight.

    Weights are cast to bf16 (native MXU operand dtype; f32 accumulate happens
    in-kernel) and zero-padded to the 128-lane boundary on the hidden/output
    feature dims so both dots are lane-aligned.  Zero padding -> zero hidden
    activations -> zero contribution, and the padded output columns are sliced
    off in-kernel, so the module semantics are unchanged.
    """
    D, Hd = w1.shape
    _, A = w2.shape
    HP = _round_up(Hd, 128)
    AP = _round_up(A, 128)
    w1_p = jnp.zeros((D, HP), jnp.bfloat16).at[:, :Hd].set(w1.astype(jnp.bfloat16))
    b1_p = jnp.zeros((1, HP), jnp.float32).at[0, :Hd].set(b1.astype(jnp.float32))
    w2_p = jnp.zeros((HP, AP), jnp.bfloat16).at[:Hd, :A].set(w2.astype(jnp.bfloat16))
    b2_p = jnp.zeros((1, AP), jnp.float32).at[0, :A].set(b2.astype(jnp.float32))
    return {"w1": w1_p, "b1": b1_p, "w2": w2_p, "b2": b2_p,
            "hidden_size": Hd, "action_size": A}


def _pick_batch_tile(B: int, batch_tile: int) -> int:
    """Rows per grid step: multiple of 8 (sublane rule), large (amortizes the
    ~0.35 us per-step overhead), but >= 2 grid steps when B allows so v7x's
    second TensorCore gets work."""
    if B <= 8:
        return B                                    # one full-dim block, grid=(1,)
    tb = max(8, (min(batch_tile, B) // 8) * 8)      # force multiple of 8
    half = _round_up((B + 1) // 2, 8)               # cap so grid has >= 2 steps
    return max(8, min(tb, half))


def mlp_forward(x_nchw, params, *, batch_tile=512):
    """Forward of Flatten -> Linear(D, Hd) -> ReLU -> Linear(Hd, A).

    x_nchw: (B, C, H, W) f32; params from prepare_mlp_params().
    Returns (B, A) f32 (same semantics as the PyTorch module, bf16 MXU operands).
    """
    w1_p, b1_p, w2_p, b2_p = params["w1"], params["b1"], params["w2"], params["b2"]
    Hd, A = params["hidden_size"], params["action_size"]

    B = x_nchw.shape[0]
    x = x_nchw.reshape(B, -1)                       # nn.Flatten; no pad/cast copy
    D = x.shape[1]
    HP = w1_p.shape[1]
    AP = w2_p.shape[1]

    TB = _pick_batch_tile(B, batch_tile)
    grid = (pl.cdiv(B, TB),)

    cost = pl.CostEstimate(                         # honest scheduling hint
        flops=2 * B * D * Hd + 2 * B * Hd * A,
        transcendentals=0,
        bytes_accessed=(B * D * 4                    # x (f32, read)
                        + w1_p.size * 2 + w2_p.size * 2
                        + b1_p.size * 4 + b2_p.size * 4
                        + B * A * 4),                # narrow f32 output
    )

    return pl.pallas_call(
        mlp_kernel,
        out_shape=jax.ShapeDtypeStruct((B, A), jnp.float32),
        grid=grid,
        in_specs=[
            pl.BlockSpec((TB, D), lambda i: (i, 0)),     # x tile: pipelined per step
            # Grid-invariant blocks (constant index_map): DMA'd once, VMEM-resident.
            pl.BlockSpec((D, HP), lambda i: (0, 0)),     # w1 (bf16)
            pl.BlockSpec((1, HP), lambda i: (0, 0)),     # b1 (f32)
            pl.BlockSpec((HP, AP), lambda i: (0, 0)),    # w2 (bf16)
            pl.BlockSpec((1, AP), lambda i: (0, 0)),     # b2 (f32)
        ],
        out_specs=pl.BlockSpec((TB, A), lambda i: (i, 0)),   # narrow (B, A) output
        compiler_params=pltpu.CompilerParams(
            dimension_semantics=("parallel",),       # shard batch across TCs on v7x
        ),
        cost_estimate=cost,
    )(x, w1_p, b1_p, w2_p, b2_p)


if __name__ == "__main__":
    # Small shapes consistent with the module: image (C=4, H=16, W=16),
    # input_size = 1024, hidden_size = 32, action_size = 8, batch = 2.
    B, C, H, W = 2, 4, 16, 16
    input_size = C * H * W
    hidden_size = 32
    action_size = 8

    key = jax.random.PRNGKey(0)
    kx, k1, k2, k3, k4 = jax.random.split(key, 5)

    x = jax.random.normal(kx, (B, C, H, W), dtype=jnp.float32)

    # Deterministic PyTorch-style uniform init, stored transposed to (in, out).
    bound1 = 1.0 / jnp.sqrt(input_size)
    w1 = jax.random.uniform(k1, (input_size, hidden_size), jnp.float32, -bound1, bound1)
    b1 = jax.random.uniform(k2, (hidden_size,), jnp.float32, -bound1, bound1)

    bound2 = 1.0 / jnp.sqrt(hidden_size)
    w2 = jax.random.uniform(k3, (hidden_size, action_size), jnp.float32, -bound2, bound2)
    b2 = jax.random.uniform(k4, (action_size,), jnp.float32, -bound2, bound2)

    # One-time parameter prep (init-time), reused across forward calls.
    params = prepare_mlp_params(w1, b1, w2, b2)

    out = jax.block_until_ready(mlp_forward(x, params))

    # True f32 reference for the PyTorch module; bf16 MXU operands give ~1e-3
    # absolute deviation at these magnitudes.
    x_flat = x.reshape(B, -1)
    ref = jnp.maximum(x_flat @ w1 + b1, 0.0) @ w2 + b2

    assert out.shape == (B, action_size)
    max_err = float(jnp.max(jnp.abs(out - ref)))
    assert jnp.allclose(out, ref, atol=2e-2, rtol=2e-2), max_err

    print("KERNEL_OK")
</pallas_src>

<mosaic_0001>
module attributes {stable_mosaic.version = 11 : i64} {
  func.func @mlp_kernel(%arg0: i32, %arg1: memref<2x1024xf32, #tpu.memory_space<vmem>>, %arg2: memref<1024x128xbf16, #tpu.memory_space<vmem>>, %arg3: memref<1x128xf32, #tpu.memory_space<vmem>>, %arg4: memref<128x128xbf16, #tpu.memory_space<vmem>>, %arg5: memref<1x128xf32, #tpu.memory_space<vmem>>, %arg6: memref<2x8xf32, #tpu.memory_space<vmem>>) attributes {dimension_semantics = [#tpu.dimension_semantics<parallel>], iteration_bounds = array<i64: 1>, scalar_prefetch = 0 : i64, scratch_operands = 0 : i64, tpu.core_type = #tpu.core_type<tc>, window_params = [{transform_indices = @transform_0, window_bounds = array<i64: 2, 1024>}, {pipeline_mode = #tpu.pipeline_mode<synchronous>, transform_indices = @transform_1, window_bounds = array<i64: 1024, 128>}, {pipeline_mode = #tpu.pipeline_mode<synchronous>, transform_indices = @transform_2, window_bounds = array<i64: 1, 128>}, {pipeline_mode = #tpu.pipeline_mode<synchronous>, transform_indices = @transform_3, window_bounds = array<i64: 128, 128>}, {pipeline_mode = #tpu.pipeline_mode<synchronous>, transform_indices = @transform_4, window_bounds = array<i64: 1, 128>}, {transform_indices = @transform_5, window_bounds = array<i64: 2, 8>}]} {
    %c0 = arith.constant 0 : index
    %c0_0 = arith.constant 0 : index
    %0 = vector.load %arg1[%c0, %c0_0] : memref<2x1024xf32, #tpu.memory_space<vmem>>, vector<2x1024xf32>
    %1 = arith.truncf %0 : vector<2x1024xf32> to vector<2x1024xbf16>
    %c0_1 = arith.constant 0 : index
    %c0_2 = arith.constant 0 : index
    %2 = vector.load %arg2[%c0_1, %c0_2] : memref<1024x128xbf16, #tpu.memory_space<vmem>>, vector<1024x128xbf16>
    %cst = arith.constant dense<0.000000e+00> : vector<2x128xf32>
    %3 = tpu.matmul %1, %2, %cst {dimension_numbers = #tpu.dot_dimension_numbers<[1], [0], [0], [1], [0, 0, 1, 1], [], []>} : vector<2x1024xbf16>, vector<1024x128xbf16>, vector<2x128xf32> -> vector<2x128xf32>
    %c0_3 = arith.constant 0 : index
    %c0_4 = arith.constant 0 : index
    %4 = vector.load %arg3[%c0_3, %c0_4] : memref<1x128xf32, #tpu.memory_space<vmem>>, vector<1x128xf32>
    %5 = vector.broadcast %4 : vector<1x128xf32> to vector<2x128xf32>
    %6 = arith.addf %3, %5 : vector<2x128xf32>
    %cst_5 = arith.constant 0.000000e+00 : f32
    %7 = vector.broadcast %cst_5 : f32 to vector<2x128xf32>
    %8 = arith.maximumf %6, %7 : vector<2x128xf32>
    %9 = arith.truncf %8 : vector<2x128xf32> to vector<2x128xbf16>
    %c0_6 = arith.constant 0 : index
    %c0_7 = arith.constant 0 : index
    %10 = vector.load %arg4[%c0_6, %c0_7] : memref<128x128xbf16, #tpu.memory_space<vmem>>, vector<128x128xbf16>
    %cst_8 = arith.constant dense<0.000000e+00> : vector<2x128xf32>
    %11 = tpu.matmul %9, %10, %cst_8 {dimension_numbers = #tpu.dot_dimension_numbers<[1], [0], [0], [1], [0, 0, 1, 1], [], []>} : vector<2x128xbf16>, vector<128x128xbf16>, vector<2x128xf32> -> vector<2x128xf32>
    %c0_9 = arith.constant 0 : index
    %c0_10 = arith.constant 0 : index
    %12 = vector.load %arg5[%c0_9, %c0_10] : memref<1x128xf32, #tpu.memory_space<vmem>>, vector<1x128xf32>
    %13 = vector.broadcast %12 : vector<1x128xf32> to vector<2x128xf32>
    %14 = arith.addf %11, %13 : vector<2x128xf32>
    %15 = vector.extract_strided_slice %14 {offsets = [0, 0], sizes = [2, 8], strides = [1, 1]} : vector<2x128xf32> to vector<2x8xf32>
    %c0_11 = arith.constant 0 : index
    %c0_12 = arith.constant 0 : index
    %16 = vector.load %arg6[%c0_11, %c0_12] : memref<2x8xf32, #tpu.memory_space<vmem>>, vector<2x8xf32>
    tpu.vector_store %arg6[%c0_11, %c0_12], %15 {strides = array<i32>} : memref<2x8xf32, #tpu.memory_space<vmem>>, vector<2x8xf32>,
    return
  }
  func.func @transform_0(%arg0: i32) -> (i32, i32) {
    %c0_i32 = arith.constant 0 : i32
    %c0_i32_0 = arith.constant 0 : i32
    return %arg0, %c0_i32 : i32, i32
  }
  func.func @transform_1(%arg0: i32) -> (i32, i32) {
    %c0_i32 = arith.constant 0 : i32
    %c0_i32_0 = arith.constant 0 : i32
    %c0_i32_1 = arith.constant 0 : i32
    return %c0_i32, %c0_i32_0 : i32, i32
  }
  func.func @transform_2(%arg0: i32) -> (i32, i32) {
    %c0_i32 = arith.constant 0 : i32
    %c0_i32_0 = arith.constant 0 : i32
    %c0_i32_1 = arith.constant 0 : i32
    return %c0_i32, %c0_i32_0 : i32, i32
  }
  func.func @transform_3(%arg0: i32) -> (i32, i32) {
    %c0_i32 = arith.constant 0 : i32
    %c0_i32_0 = arith.constant 0 : i32
    %c0_i32_1 = arith.constant 0 : i32
    return %c0_i32, %c0_i32_0 : i32, i32
  }
  func.func @transform_4(%arg0: i32) -> (i32, i32) {
    %c0_i32 = arith.constant 0 : i32
    %c0_i32_0 = arith.constant 0 : i32
    %c0_i32_1 = arith.constant 0 : i32
    return %c0_i32, %c0_i32_0 : i32, i32
  }
  func.func @transform_5(%arg0: i32) -> (i32, i32) {
    %c0_i32 = arith.constant 0 : i32
    %c0_i32_0 = arith.constant 0 : i32
    return %arg0, %c0_i32 : i32, i32
  }
}

</mosaic_0001>

<bundles_post_ra>
// kernel: tpu_custom_call.1
= control target key start
LH: loop header
LB: loop body
LE: loop exit
PB: predicated region body
PF: predicated region fallthrough
CT: control target
= control target key end

     0   :  { %10 = vsyncpa [#allocation3], 0  ;;  %s1398_s0 = inlined_call_operand.hbm [shape: f32[2,1024], index: 0, kind: input, shape index: {}]   ;;  %s1399_s1 = inlined_call_operand.hbm [shape: bf16[1024,128], index: 1, kind: input, shape index: {}]   ;;  %s1400_s2 = inlined_call_operand.vmem [shape: f32[1,128], index: 2, kind: input, shape index: {}]   ;;  %s1401_s3 = inlined_call_operand.hbm [shape: bf16[128,128], index: 3, kind: input, shape index: {}]   ;;  %s1402_s4 = inlined_call_operand.vmem [shape: f32[1,128], index: 4, kind: input, shape index: {}]   ;;  %s1403_s5 = inlined_call_operand.hbm [shape: f32[2,8], index: 5, kind: output, shape index: {}]  }
   0x1   :  { %11 = vsyncpa [#allocation6], 0 }
   0x2   :  { %12 = vsyncpa [#allocation4], 0  ;;  %s1293_s18 = smov [#allocation5]   ;;  %s1199_s22 = scalar_lea.hbm %s1399_s1, 8192 }
   0x3   :  { %s28_s19 = sshll.u32 %s1293_s18, 4  ;;  %p1200_p0 = scmp.ne.s32.totalorder %s1399_s1, %s1199_s22  ;;  %s29_s19 = int_to_ptr.vmem [resolvable:$true] %s28_s19 }
   0x4   :  { %p1203_p1 = scmp.lt.u32.totalorder %s1199_s22, %s1399_s1 }
   0x6   :  { %p1205_p2 = pnand %p1203_p1, %p1200_p0 }
   0x8   :  { %1208 = shalt.err (!%p1205_p2)
}
   0x9   :  { %s1209_s27 = scalar_lea.vmem %s29_s19, 8192  ;;  %p1214_p4 = scmp.lt.s32.totalorder %s29_s19, %s29_s19 }
   0xa   :  { %p1210_p3 = scmp.ne.s32.totalorder %s29_s19, %s1209_s27  ;;  %p1215_p5 = scmp.lt.s32.totalorder %s1209_s27, %s1209_s27 }
   0xc   :  { %p1216_p6 = por %p1215_p5, %p1214_p4 }
   0xe   :  { %p1217_p7 = pnand %p1216_p6, %p1210_p3 }
  0x10   :  { %1220 = shalt.err (!%p1217_p7)
}
  0x11   :  { %s1294_s28 = smov 64   ;;  %s1295_s29 = smov 4  }
  0x12   :  { %34 = dma.hbm_to_vmem [thread:$0]  %s1399_s1, 8192, %s29_s19, [#allocation6], %s1294_s28, %s1294_s28, %s1295_s29  }
  0x13   :  { %s1296_s7 = smov [#allocation2]   ;;  %s1297_s9 = smov [#allocation7]  }
  0x14   :  { %s19_s8 = sshll.u32 %s1296_s7, 4  ;;  %s42_s10 = sshll.u32 %s1297_s9, 4  ;;  %s20_s8 = int_to_ptr.vmem [resolvable:$true] %s19_s8  ;;  %s43_s10 = int_to_ptr.vmem [resolvable:$true] %s42_s10 }
  0x15   :  { %s1221_s13 = scalar_lea.hbm %s1398_s0, 256 }
  0x16   :  { %p1222_p8 = scmp.ne.s32.totalorder %s1398_s0, %s1221_s13  ;;  %p1225_p9 = scmp.lt.u32.totalorder %s1221_s13, %s1398_s0 }
  0x18   :  { %p1227_p10 = pnand %p1225_p9, %p1222_p8 }
  0x1a   :  { %1230 = shalt.err (!%p1227_p10)
}
  0x1b   :  { %s1231_s1 = scalar_lea.vmem %s20_s8, 256  ;;  %p1236_p12 = scmp.lt.s32.totalorder %s20_s8, %s20_s8 }
  0x1c   :  { %p1232_p11 = scmp.ne.s32.totalorder %s20_s8, %s1231_s1  ;;  %p1237_p13 = scmp.lt.s32.totalorder %s1231_s1, %s1231_s1 }
  0x1e   :  { %p1238_p0 = por %p1237_p13, %p1236_p12 }
  0x20   :  { %p1239_p1 = pnand %p1238_p0, %p1232_p11 }
  0x22   :  { %1242 = shalt.err (!%p1239_p1)
}
  0x23   :  { %22 = dma.hbm_to_vmem [thread:$0]  %s1398_s0, 256, %s20_s8, [#allocation3]  }
  0x24   :  { %s1243_s22 = scalar_lea.hbm %s1401_s3, 1024 }
  0x25   :  { %p1244_p2 = scmp.ne.s32.totalorder %s1401_s3, %s1243_s22  ;;  %p1247_p3 = scmp.lt.u32.totalorder %s1243_s22, %s1401_s3 }
  0x27   :  { %p1249_p4 = pnand %p1247_p3, %p1244_p2 }
  0x29   :  { %1252 = shalt.err (!%p1249_p4)
}
  0x2a   :  { %s1253_s27 = scalar_lea.vmem %s43_s10, 1024  ;;  %p1258_p6 = scmp.lt.s32.totalorder %s43_s10, %s43_s10 }
  0x2b   :  { %p1254_p5 = scmp.ne.s32.totalorder %s43_s10, %s1253_s27  ;;  %p1259_p7 = scmp.lt.s32.totalorder %s1253_s27, %s1253_s27 }
  0x2d   :  { %p1260_p8 = por %p1259_p7, %p1258_p6 }
  0x2f   :  { %p1261_p9 = pnand %p1260_p8, %p1254_p5 }
  0x31   :  { %1264 = shalt.err (!%p1261_p9)
}
  0x32   :  { %48 = dma.hbm_to_vmem [thread:$0]  %s1401_s3, 1024, %s43_s10, [#allocation6], %s1294_s28, %s1294_s28, %s1295_s29  }
  0x33   :  { %1287 = dma.done.wait [#allocation3], 256  }
  0x34   :  { %1288 = vsyncadd [#allocation3], 4294967040 }
  0x35   :  { %1289 = dma.done.wait [#allocation6], 9216  }
  0x36   :  { %1290 = vsyncadd [#allocation6], 4294958080  ;;  %v1125_v0 = vld [vmem:[#allocation5 + $0x40] sm:$0xff]   ;;  %v1129_v4 = vld [vmem:[#allocation5 + $0x48] sm:$0xff]   ;;  %v1298_v22 = vmov 1983009808   ;;  %v69_v24 = vlaneseq }
  0x37   :  { %v1126_v1 = vld [vmem:[#allocation5 + $0xc0] sm:$0xff]   ;;  %999 = vmatprep.subr.bf16.mxu0 %v1125_v0  ;;  %v1130_v5 = vld [vmem:[#allocation5 + $0xc8] sm:$0xff]   ;;  %v1133_v8 = vld [vmem:[#allocation5 + $0x50] sm:$0xff]   ;;  %v67_v23 = vunpack.c.l.s4 %v1298_v22  ;;  %vm1300_vm0 = vmmov 0   ;;  %s1301_s6 = smov [#allocation8]   ;;  %vm907_vm1 = vcmask 58368  }
  0x38   :  { %v1127_v2 = vld [vmem:[#allocation5] sm:$0xff]   ;;  %1021 = vmatprep.subr.bf16.mxu1 %v1126_v1  ;;  %v1131_v6 = vld [vmem:[#allocation5 + $0x8] sm:$0xff]   ;;  %v1134_v9 = vld [vmem:[#allocation5 + $0xd0] sm:$0xff]   ;;  %v70_v30 = vshrl.u32 %v69_v24, 7  ;;  %s915_s7 = sshll.u32 %s1301_s6, 4  ;;  %s916_s7 = int_to_ptr.vmem [resolvable:$true] %s915_s7 }
  0x39   :  { %v1128_v3 = vld [vmem:[#allocation5 + $0x80] sm:$0xff]   ;;  %1000 = vmatpush3.bf16.msra.mxu0 %v1127_v2  ;;  %v1132_v7 = vld [vmem:[#allocation5 + $0x88] sm:$0xff]   ;;  %v1135_v10 = vld [vmem:[#allocation5 + $0x10] sm:$0xff]   ;;  %v68_v29 = vunpack.c.0.s8 %v67_v23  ;;  %s1265_s8 = scalar_lea.vmem %s916_s7, 32  ;;  %p1270_p11 = scmp.lt.s32.totalorder %s916_s7, %s916_s7 }
  0x3a   :  { %1022 = vmatpush3.bf16.msra.mxu1 %v1128_v3  ;;  %1001 = vmatprep.subr.bf16.mxu0 %v1129_v4  ;;  %v1136_v11 = vld [vmem:[#allocation5 + $0x90] sm:$0xff]   ;;  %v1137_v12 = vld [vmem:[#allocation5 + $0x58] sm:$0xff]   ;;  %v1141_v16 = vld [vmem:[#allocation5 + $0x60] sm:$0xff]   ;;  %p1266_p10 = scmp.ne.s32.totalorder %s916_s7, %s1265_s8  ;;  %p1271_p12 = scmp.lt.s32.totalorder %s1265_s8, %s1265_s8 }
  0x3b   :  { %1023 = vmatprep.subr.bf16.mxu1 %v1130_v5  ;;  %v1138_v13 = vld [vmem:[#allocation5 + $0xd8] sm:$0xff]   ;;  %v1142_v17 = vld [vmem:[#allocation5 + $0xe0] sm:$0xff]   ;;  %v1145_v20 = vld [vmem:[#allocation5 + $0x68] sm:$0xff]   ;;  %v1374_v35 = vsub.s32 %v68_v29, %v70_v30 }
  0x3c   :  { %v1139_v14 = vld [vmem:[#allocation5 + $0x18] sm:$0xff]   ;;  %v1143_v18 = vld [vmem:[#allocation5 + $0x20] sm:$0xff]   ;;  %v1146_v21 = vld [vmem:[#allocation5 + $0xe8] sm:$0xff]   ;;  %p1272_p13 = por %p1271_p12, %p1270_p11 }
  0x3d   :  { %1002 = vmatpush3.bf16.msra.mxu0 %v1131_v6  ;;  %v1140_v15 = vld [vmem:[#allocation5 + $0x98] sm:$0xff]   ;;  %v1144_v19 = vld [vmem:[#allocation5 + $0xa0] sm:$0xff]   ;;  %v1147_v25 = vld [vmem:[#allocation5 + $0x28] sm:$0xff]  }
  0x3e   :  { %1024 = vmatpush3.bf16.msra.mxu1 %v1132_v7  ;;  %1003 = vmatprep.subr.bf16.mxu0 %v1133_v8  ;;  %v1148_v26 = vld [vmem:[#allocation5 + $0xa8] sm:$0xff]   ;;  %v1149_v27 = vld [vmem:[#allocation5 + $0x70] sm:$0xff]   ;;  %v1153_v33 = vld [vmem:[#allocation5 + $0x78] sm:$0xff]   ;;  %p1273_p0 = pnand %p1272_p13, %p1266_p10 }
  0x3f   :  { %1025 = vmatprep.subr.bf16.mxu1 %v1134_v9  ;;  %v1150_v28 = vld [vmem:[#allocation5 + $0xf0] sm:$0xff]   ;;  %v1154_v34 = vld [vmem:[#allocation5 + $0xf8] sm:$0xff]   ;;  %v1158_v41 = vld [vmem:[#allocation5 + $0x140] sm:$0xff]  }
  0x40   :  { %v1151_v31 = vld [vmem:[#allocation5 + $0x30] sm:$0xff]   ;;  %v1155_v36 = vld [vmem:[#allocation5 + $0x38] sm:$0xff]   ;;  %v1159_v42 = vld [vmem:[#allocation5 + $0x1c0] sm:$0xff]  }
  0x41   :  { %1004 = vmatpush3.bf16.msra.mxu0 %v1135_v10  ;;  %v1152_v32 = vld [vmem:[#allocation5 + $0xb0] sm:$0xff]   ;;  %v1156_v37 = vld [vmem:[#allocation5 + $0xb8] sm:$0xff]   ;;  %v1160_v46 = vld [vmem:[#allocation5 + $0x100] sm:$0xff]  }
  0x42   :  { %1026 = vmatpush3.bf16.msra.mxu1 %v1136_v11  ;;  %1005 = vmatprep.subr.bf16.mxu0 %v1137_v12  ;;  %v61_v38 = vld [vmem:[#allocation2] sm:$0xff]  ;;  %v1161_v49 = vld [vmem:[#allocation5 + $0x180] sm:$0xff]   ;;  %v1162_v51 = vld [vmem:[#allocation5 + $0x148] sm:$0xff]  }
  0x43   :  { %1027 = vmatprep.subr.bf16.mxu1 %v1138_v13  ;;  %v72_v39 = vrot.slane %v61_v38, %v1374_v35  ;;  %v65_v40 = vcombine.high %v61_v38, %v61_v38  ;;  %v1163_v53 = vld [vmem:[#allocation5 + $0x1c8] sm:$0xff]   ;;  %v1166_v56 = vld [vmem:[#allocation5 + $0x150] sm:$0xff]   ;;  %v1170_v60 = vld [vmem:[#allocation5 + $0x158] sm:$0xff]  }
  0x44   :  { %v1164_v54 = vld [vmem:[#allocation5 + $0x108] sm:$0xff]   ;;  %v1167_v57 = vld [vmem:[#allocation5 + $0x1d0] sm:$0xff]   ;;  %v1171_v61 = vld [vmem:[#allocation5 + $0x1d8] sm:$0xff]  }
  0x45   :  { %1006 = vmatpush3.bf16.msra.mxu0 %v1139_v14  ;;  %v80_v43 = vcombine.high %v72_v39, %v72_v39  ;;  %v79_v44 = vrot.slane %v65_v40, %v1374_v35  ;;  %v107_v45 = vpack.c.bf16 %v72_v39, %v72_v39  ;;  %v1165_v55 = vld [vmem:[#allocation5 + $0x188] sm:$0xff]   ;;  %v1168_v58 = vld [vmem:[#allocation5 + $0x110] sm:$0xff]   ;;  %v1172_v62 = vld [vmem:[#allocation5 + $0x118] sm:$0xff]  }
  0x46   :  { %1028 = vmatpush3.bf16.msra.mxu1 %v1140_v15  ;;  %1007 = vmatprep.subr.bf16.mxu0 %v1141_v16  ;;  %v1169_v59 = vld [vmem:[#allocation5 + $0x190] sm:$0xff]   ;;  %v1173_v63 = vld [vmem:[#allocation5 + $0x198] sm:$0xff]   ;;  %v1174_v0 = vld [vmem:[#allocation5 + $0x160] sm:$0xff]  }
  0x47   :  { %1029 = vmatprep.subr.bf16.mxu1 %v1142_v17  ;;  %v108_v47 = vpack.c.bf16 %v80_v43, %v80_v43  ;;  %v81_v48 = vcombine.high %v79_v44, %v79_v44  ;;  %v109_v50 = vpack.c.bf16 %v79_v44, %v79_v44  ;;  %v1175_v1 = vld [vmem:[#allocation5 + $0x1e0] sm:$0xff]   ;;  %v1178_v4 = vld [vmem:[#allocation5 + $0x168] sm:$0xff]   ;;  %v1182_v8 = vld [vmem:[#allocation5 + $0x170] sm:$0xff]  }
  0x48   :  { %v1176_v2 = vld [vmem:[#allocation5 + $0x120] sm:$0xff]   ;;  %v1179_v5 = vld [vmem:[#allocation5 + $0x1e8] sm:$0xff]   ;;  %v1183_v9 = vld [vmem:[#allocation5 + $0x1f0] sm:$0xff]  }
  0x49   :  { %1008 = vmatpush3.bf16.msra.mxu0 %v1143_v18  ;;  %666 = vmatprep.mubr.bf16.mxu0 %v108_v47  ;;  %v110_v52 = vpack.c.bf16 %v81_v48, %v81_v48  ;;  %v1177_v3 = vld [vmem:[#allocation5 + $0x1a0] sm:$0xff]   ;;  %v1180_v6 = vld [vmem:[#allocation5 + $0x128] sm:$0xff]   ;;  %v1184_v10 = vld [vmem:[#allocation5 + $0x130] sm:$0xff]  }
  0x4a   :  { %1030 = vmatpush3.bf16.msra.mxu1 %v1144_v19  ;;  %1009 = vmatprep.subr.bf16.mxu0 %v1145_v20  ;;  %v1181_v7 = vld [vmem:[#allocation5 + $0x1a8] sm:$0xff]   ;;  %v1185_v11 = vld [vmem:[#allocation5 + $0x1b0] sm:$0xff]   ;;  %v1186_v12 = vld [vmem:[#allocation5 + $0x178] sm:$0xff]  }
  0x4b   :  { %1031 = vmatprep.subr.bf16.mxu1 %v1146_v21  ;;  %706 = vmatprep.mubr.bf16.mxu1 %v110_v52  ;;  %v1187_v13 = vld [vmem:[#allocation5 + $0x1f8] sm:$0xff]   ;;  %v1193_v29 = vld [vmem:[#allocation7 + $0x10] sm:$0xff]  }
  0x4c   :  { %v1188_v14 = vld [vmem:[#allocation5 + $0x138] sm:$0xff]  }
  0x4d   :  { %1010 = vmatpush3.bf16.msra.mxu0 %v1147_v25  ;;  %v62_v15 = vld [vmem:[#allocation2 + $0x8] sm:$0xff] }
  0x4e   :  { %1032 = vmatpush3.bf16.msra.mxu1 %v1148_v26  ;;  %1011 = vmatprep.subr.bf16.mxu0 %v1149_v27  ;;  %v1189_v16 = vld [vmem:[#allocation5 + $0x1b8] sm:$0xff]   ;;  %v89_v17 = vrot.slane %v62_v15, %v1374_v35  ;;  %v82_v18 = vcombine.high %v62_v15, %v62_v15  ;;  %v1191_v26 = vld [vmem:[#allocation7] sm:$0xff]   ;;  %v1299_v27 = vmov 0.0  }
  0x4f   :  { %1033 = vmatprep.subr.bf16.mxu1 %v1150_v28  ;;  %v1192_v28 = vld [vmem:[#allocation7 + $0x8] sm:$0xff]   ;;  %v1194_v30 = vld [vmem:[#allocation7 + $0x18] sm:$0xff]  }
  0x50   :  { %v97_v19 = vcombine.high %v89_v17, %v89_v17  ;;  %v96_v20 = vrot.slane %v82_v18, %v1374_v35  ;;  %v111_v21 = vpack.c.bf16 %v89_v17, %v89_v17 }
  0x51   :  { %1012 = vmatpush3.bf16.msra.mxu0 %v1151_v31  ;;  %v1195_v31 = vld [vmem:[#allocation7 + $0x20] sm:$0xff]  }
  0x52   :  { %1034 = vmatpush3.bf16.msra.mxu1 %v1152_v32  ;;  %1013 = vmatprep.subr.bf16.mxu0 %v1153_v33  ;;  %v112_v22 = vpack.c.bf16 %v97_v19, %v97_v19  ;;  %v98_v23 = vcombine.high %v96_v20, %v96_v20  ;;  %v113_v24 = vpack.c.bf16 %v96_v20, %v96_v20  ;;  %v1196_v32 = vld [vmem:[#allocation7 + $0x28] sm:$0xff]   ;;  %v1197_v33 = vld [vmem:[#allocation7 + $0x30] sm:$0xff]  }
  0x53   :  { %1035 = vmatprep.subr.bf16.mxu1 %v1154_v34  ;;  %v1198_v34 = vld [vmem:[#allocation7 + $0x38] sm:$0xff]  }
  0x54   :  { %v114_v25 = vpack.c.bf16 %v98_v23, %v98_v23 }
  0x55   :  { %1014 = vmatpush3.bf16.msra.mxu0 %v1155_v36  ;;  %v925_v36 = vld [vmem:[%s1400_s2] ss:$0 sm:$0xff] }
  0x56   :  { %1036 = vmatpush3.bf16.msra.mxu1 %v1156_v37  ;;  %1043 = vmatprep.subr.bf16.mxu0 %v1158_v41 }
  0x57   :  { %1065 = vmatprep.subr.bf16.mxu1 %v1159_v42 }
  0x58   :  { %667 = vmatmul.mubr.bf16.vlgmr.msra.gmra.mrb[0].mxu0 %v107_v45 }
  0x59   :  { %1044 = vmatpush3.bf16.msra.mxu0 %v1160_v46  ;;  %707 = vmatmul.mubr.bf16.vlgmr.msra.gmra.mrb[0].mxu1 %v109_v50 }
  0x5a   :  { %1045 = vmatprep.subr.bf16.mxu0 %v1162_v51  ;;  %1066 = vmatpush3.bf16.msra.mxu1 %v1161_v49 }
  0x5b   :  { %1067 = vmatprep.subr.bf16.mxu1 %v1163_v53  ;;  %746 = vmatprep.mubr.bf16.mxu0 %v112_v22 }
  0x5c   :  { %786 = vmatprep.mubr.bf16.mxu1 %v114_v25 }
  0x5d   :  { %1046 = vmatpush3.bf16.msra.mxu0 %v1164_v54 }
  0x5e   :  { %1047 = vmatprep.subr.bf16.mxu0 %v1166_v56  ;;  %1068 = vmatpush3.bf16.msra.mxu1 %v1165_v55 }
  0x5f   :  { %1069 = vmatprep.subr.bf16.mxu1 %v1167_v57 }
  0x61   :  { %1048 = vmatpush3.bf16.msra.mxu0 %v1168_v58 }
  0x62   :  { %1049 = vmatprep.subr.bf16.mxu0 %v1170_v60  ;;  %1070 = vmatpush3.bf16.msra.mxu1 %v1169_v59 }
  0x63   :  { %1071 = vmatprep.subr.bf16.mxu1 %v1171_v61 }
  0x65   :  { %1050 = vmatpush3.bf16.msra.mxu0 %v1172_v62  ;;  %v990_v62 = vld [vmem:[%s1402_s4] ss:$0 sm:$0xff] }
  0x66   :  { %1051 = vmatprep.subr.bf16.mxu0 %v1174_v0  ;;  %1072 = vmatpush3.bf16.msra.mxu1 %v1173_v63 }
  0x67   :  { %1073 = vmatprep.subr.bf16.mxu1 %v1175_v1 }
  0x69   :  { %1052 = vmatpush3.bf16.msra.mxu0 %v1176_v2 }
  0x6a   :  { %1053 = vmatprep.subr.bf16.mxu0 %v1178_v4  ;;  %1074 = vmatpush3.bf16.msra.mxu1 %v1177_v3 }
  0x6b   :  { %1075 = vmatprep.subr.bf16.mxu1 %v1179_v5 }
  0x6d   :  { %1054 = vmatpush3.bf16.msra.mxu0 %v1180_v6 }
  0x6e   :  { %1055 = vmatprep.subr.bf16.mxu0 %v1182_v8  ;;  %1076 = vmatpush3.bf16.msra.mxu1 %v1181_v7 }
  0x6f   :  { %1077 = vmatprep.subr.bf16.mxu1 %v1183_v9 }
  0x71   :  { %1056 = vmatpush3.bf16.msra.mxu0 %v1184_v10 }
  0x72   :  { %1057 = vmatprep.subr.bf16.mxu0 %v1186_v12  ;;  %1078 = vmatpush3.bf16.msra.mxu1 %v1185_v11 }
  0x73   :  { %1079 = vmatprep.subr.bf16.mxu1 %v1187_v13 }
  0x75   :  { %1058 = vmatpush3.bf16.msra.mxu0 %v1188_v14 }
  0x76   :  { %1080 = vmatpush3.bf16.msra.mxu1 %v1189_v16  ;;  %1096 = vmatprep.subr.bf16.mxu0 %v1299_v27 }
  0x78   :  { %747 = vmatmul.mubr.bf16.vlgmr.msra.gmra.mrb[4].mxu0 %v111_v21 }
  0x79   :  { %787 = vmatmul.mubr.bf16.vlgmr.msra.gmra.mrb[4].mxu1 %v113_v24  ;;  %1097 = vmatpush3.bf16.msra.mxu0 %v1191_v26 }
  0x7a   :  { %1098 = vmatprep.subr.bf16.mxu0 %v1299_v27  ;;  %1112 = vmatprep.mubr.msk.bf16.mxu0 %vm1300_vm0, %v1299_v27 }
  0x7d   :  { %1099 = vmatpush3.bf16.msra.mxu0 %v1192_v28 }
  0x7e   :  { %1100 = vmatprep.subr.bf16.mxu0 %v1299_v27 }
  0x81   :  { %1101 = vmatpush3.bf16.msra.mxu0 %v1193_v29 }
  0x82   :  { %1102 = vmatprep.subr.bf16.mxu0 %v1299_v27 }
  0x85   :  { %1103 = vmatpush3.bf16.msra.mxu0 %v1194_v30 }
  0x86   :  { %1104 = vmatprep.subr.bf16.mxu0 %v1299_v27 }
  0x89   :  { %1105 = vmatpush3.bf16.msra.mxu0 %v1195_v31 }
  0x8a   :  { %1106 = vmatprep.subr.bf16.mxu0 %v1299_v27 }
  0x8d   :  { %1107 = vmatpush3.bf16.msra.mxu0 %v1196_v32 }
  0x8e   :  { %1108 = vmatprep.subr.bf16.mxu0 %v1299_v27 }
  0x91   :  { %1109 = vmatpush3.bf16.msra.mxu0 %v1197_v33 }
  0x92   :  { %1110 = vmatprep.subr.bf16.mxu0 %v1299_v27 }
  0x95   :  { %1111 = vmatpush3.bf16.msra.mxu0 %v1198_v34 }
 0x12b   :  { %v1015_v35 = vpop.f32.mrb[0].mxu0 }
 0x12c   :  { %v1016_v37 = vpop.f32.mrb[1].mxu0  ;;  %v1037_v38 = vpop.f32.mrb[0].mxu1 }
 0x12d   :  { %v1017_v39 = vadd.f32 %v1016_v37, %v1015_v35  ;;  %v1018_v40 = vpop.f32.mrb[2].mxu0  ;;  %v1038_v41 = vpop.f32.mrb[1].mxu1 }
 0x12e   :  { %v1019_v42 = vpop.f32.mrb[3].mxu0  ;;  %v1039_v44 = vadd.f32 %v1038_v41, %v1037_v38  ;;  %v1040_v45 = vpop.f32.mrb[2].mxu1 }
 0x12f   :  { %v669_v43 = vadd.f32 %v1017_v39, %v925_v36  ;;  %v1041_v46 = vpop.f32.mrb[3].mxu1 }
 0x131   :  { %v709_v47 = vadd.f32 %v1039_v44, %v669_v43 }
 0x14b   :  { %v1059_v48 = vpop.f32.mrb[4].mxu0 }
 0x14c   :  { %v1060_v49 = vpop.f32.mrb[5].mxu0  ;;  %v1081_v50 = vpop.f32.mrb[4].mxu1 }
 0x14d   :  { %v1061_v51 = vadd.f32 %v1060_v49, %v1059_v48  ;;  %v1062_v52 = vpop.f32.mrb[6].mxu0  ;;  %v1082_v53 = vpop.f32.mrb[5].mxu1 }
 0x14e   :  { %v1063_v54 = vpop.f32.mrb[7].mxu0  ;;  %v1083_v56 = vadd.f32 %v1082_v53, %v1081_v50  ;;  %v1084_v57 = vpop.f32.mrb[6].mxu1 }
 0x14f   :  { %v749_v55 = vadd.f32 %v1061_v51, %v709_v47  ;;  %v1085_v58 = vpop.f32.mrb[7].mxu1 }
 0x151   :  { %v789_v59 = vadd.f32 %v1083_v56, %v749_v55 }
 0x153   :  { %v794_v60 = vmax.f32 %v789_v59, 0.0 }
 0x155   :  { %v795_v61 = vpack.c.bf16 %v794_v60, %v794_v60 }
 0x157   :  { %1113 = vmatmul.mubr.bf16.vlgmr.msra.gmra.mrb[8].mxu0 %v795_v61 }
 0x22a   :  { %v901_v63 = vpop.f32.mrb[8].mxu0 }
 0x22b   :  { %v902_v0 = vadd.f32 %v990_v62, %v901_v63  ;;  %v1114_v1 = vpop.f32.mrb[9].mxu0 }
 0x22c   :  { %v904_v2 = vpop.f32.mrb[10].mxu0 }
 0x22d   :  { %v1115_v3 = vpop.f32.mrb[11].mxu0  ;;  %908 = vst.msk [vmem:[#allocation8] sm:$0x3] %vm907_vm1, %v902_v0 }
 0x22e   :  { %1276 = shalt.err (!%p1273_p0)
}
 0x22f   :  { %s1277_s4 = scalar_lea.hbm %s1403_s5, 32 }
 0x230   :  { %p1278_p1 = scmp.ne.s32.totalorder %s1403_s5, %s1277_s4  ;;  %p1281_p2 = scmp.lt.u32.totalorder %s1277_s4, %s1403_s5 }
 0x232   :  { %p1283_p3 = pnand %p1281_p2, %p1278_p1 }
 0x234   :  { %1286 = shalt.err (!%p1283_p3)
}
 0x235   :  { %918 = dma.vmem_to_hbm [thread:$0]  %s916_s7, 32, %s1403_s5, [#allocation4]  }
 0x236   :  { %1291 = dma.done.wait [#allocation4], 32  }
 0x237   :  { %1292 = vsyncadd [#allocation4], 4294967264 }
 0x238   :  { %922 = vsyncpa [#allocation3], 1 }
 0x239   :  { %923 = vsyncpa [#allocation6], 1 }
 0x23a   :  { %924 = vsyncpa [#allocation4], 1 }

</bundles_post_ra>
